<compile_context>
chip_gen: v7x
topology: tpu7x:2x2x1
jax: 0.10.0
libtpu: 0.0.40
codegen_flags: <defaults>
</compile_context>

<pallas_src>
import functools

import jax
import jax.numpy as jnp
from jax.experimental import pallas as pl
from jax.experimental.pallas import tpu as pltpu


def _cat_cat_kernel(x1_ref, x2_ref, o_ref, *, c1, c2, k):
    """Direct slice-stores; no concatenated intermediate is ever built."""
    c_total = c1 + c2

    # v1 = cat([x1, x2], dim=1): two straight copies into the output.
    o_ref[:, :c1, :] = x1_ref[...]
    o_ref[:, c1:c_total, :] = x2_ref[...]

    # v3 = v1[:, :k] appended after v1.  Re-store from the already-loaded
    # input refs, splitting at the x1/x2 boundary (k may exceed c1).
    k1 = min(k, c1)
    if k1 > 0:
        o_ref[:, c_total:c_total + k1, :] = x1_ref[:, :k1, :]
    if k > c1:
        k2 = k - c1
        o_ref[:, c_total + c1:c_total + c1 + k2, :] = x2_ref[:, :k2, :]


def _pick_lane_tile(hw, max_tile=4096):
    """Largest lane-dense tile (multiple of 128) dividing hw, else full hw."""
    if hw % 128 != 0:
        return hw  # full-extent block is always legal
    tile = (min(hw, max_tile) // 128) * 128
    while hw % tile != 0:
        tile -= 128
    return tile


def model_forward(x1, x2):
    """Pallas equivalent of Model.forward(x1, x2)."""
    n, c1, h, w = x1.shape
    n2, c2, h2, w2 = x2.shape
    assert n == n2 and h == h2 and w == w2, "cat(dim=1) requires matching N,H,W"

    c_total = c1 + c2
    # v3 = v1[:, 0:x2.size(3)] -> python-level slice, clamped like torch/numpy
    k = min(w2, c_total)
    c_out = c_total + k

    hw = h * w
    # Lane-dense layout: put H*W on the lane (last) axis.
    x1f = x1.reshape(n, c1, hw)
    x2f = x2.reshape(n, c2, hw)

    tile = _pick_lane_tile(hw)
    n_tiles = hw // tile

    kernel = functools.partial(_cat_cat_kernel, c1=c1, c2=c2, k=k)

    itemsize = jnp.dtype(x1.dtype).itemsize
    bytes_in = (x1.size + x2.size) * itemsize
    bytes_out = n * c_out * hw * itemsize

    out_flat = pl.pallas_call(
        kernel,
        out_shape=jax.ShapeDtypeStruct((n, c_out, hw), x1.dtype),
        grid=(n, n_tiles),
        in_specs=[
            pl.BlockSpec((1, c1, tile), lambda b, t: (b, 0, t)),
            pl.BlockSpec((1, c2, tile), lambda b, t: (b, 0, t)),
        ],
        out_specs=pl.BlockSpec((1, c_out, tile), lambda b, t: (b, 0, t)),
        compiler_params=pltpu.CompilerParams(
            # Pure independent copies: both grid axes are parallel (lets v7x
            # shard across its two TensorCores; harmless on v5e/v6e).
            dimension_semantics=("parallel", "parallel"),
            # Keep double-buffered blocks comfortably inside v7x's smaller VMEM.
            vmem_limit_bytes=32 * 1024 * 1024,
        ),
        cost_estimate=pl.CostEstimate(
            flops=0, transcendentals=0, bytes_accessed=bytes_in + bytes_out
        ),
    )(x1f, x2f)

    return out_flat.reshape(n, c_out, h, w)


def model_forward_ref(x1, x2):
    """Pure-JAX reference for correctness checking."""
    v1 = jnp.concatenate([x1, x2], axis=1)
    v2 = v1[:, 0:9223372036854775807]
    v3 = v2[:, 0:x2.shape[3]]
    return jnp.concatenate([v1, v3], axis=1)


if __name__ == "__main__":
    key = jax.random.PRNGKey(0)
    k1, k2 = jax.random.split(key)

    # Small shapes consistent with the module's NCHW inputs (spatial dims must
    # match for cat(dim=1) to be valid).  H*W = 256 is lane-dense (2 x 128).
    # k = min(W2=16, C1+C2=8) = 8 > C1 = 4, so the split-v3 path is exercised.
    x1 = jax.random.normal(k1, (2, 4, 16, 16), dtype=jnp.float32)
    x2 = jax.random.normal(k2, (2, 4, 16, 16), dtype=jnp.float32)

    out = model_forward(x1, x2)
    out = jax.block_until_ready(out)

    ref = model_forward_ref(x1, x2)
    assert out.shape == ref.shape, (out.shape, ref.shape)
    assert jnp.allclose(out, ref), "Pallas output mismatch vs reference"

    print("KERNEL_OK")
</pallas_src>

<mosaic_0001>
module attributes {stable_mosaic.version = 11 : i64} {
  func.func @_cat_cat_kernel(%arg0: i32, %arg1: i32, %arg2: memref<1x4x256xf32, #tpu.memory_space<vmem>>, %arg3: memref<1x4x256xf32, #tpu.memory_space<vmem>>, %arg4: memref<1x16x256xf32, #tpu.memory_space<vmem>>) attributes {dimension_semantics = [#tpu.dimension_semantics<parallel>, #tpu.dimension_semantics<parallel>], iteration_bounds = array<i64: 2, 1>, scalar_prefetch = 0 : i64, scratch_operands = 0 : i64, tpu.core_type = #tpu.core_type<tc>, window_params = [{transform_indices = @transform_0, window_bounds = array<i64: 1, 4, 256>}, {transform_indices = @transform_1, window_bounds = array<i64: 1, 4, 256>}, {transform_indices = @transform_2, window_bounds = array<i64: 1, 16, 256>}]} {
    %c0 = arith.constant 0 : index
    %c0_0 = arith.constant 0 : index
    %c0_1 = arith.constant 0 : index
    %0 = vector.load %arg2[%c0, %c0_0, %c0_1] : memref<1x4x256xf32, #tpu.memory_space<vmem>>, vector<1x4x256xf32>
    %c0_2 = arith.constant 0 : index
    %c0_3 = arith.constant 0 : index
    %c0_4 = arith.constant 0 : index
    %1 = vector.load %arg4[%c0_2, %c0_3, %c0_4] : memref<1x16x256xf32, #tpu.memory_space<vmem>>, vector<1x4x256xf32>
    tpu.vector_store %arg4[%c0_2, %c0_3, %c0_4], %0 {strides = array<i32>} : memref<1x16x256xf32, #tpu.memory_space<vmem>>, vector<1x4x256xf32>,
    %c0_5 = arith.constant 0 : index
    %c0_6 = arith.constant 0 : index
    %c0_7 = arith.constant 0 : index
    %2 = vector.load %arg3[%c0_5, %c0_6, %c0_7] : memref<1x4x256xf32, #tpu.memory_space<vmem>>, vector<1x4x256xf32>
    %c0_8 = arith.constant 0 : index
    %c4 = arith.constant 4 : index
    %c0_9 = arith.constant 0 : index
    %3 = vector.load %arg4[%c0_8, %c4, %c0_9] : memref<1x16x256xf32, #tpu.memory_space<vmem>>, vector<1x4x256xf32>
    tpu.vector_store %arg4[%c0_8, %c4, %c0_9], %2 {strides = array<i32>} : memref<1x16x256xf32, #tpu.memory_space<vmem>>, vector<1x4x256xf32>,
    %c0_10 = arith.constant 0 : index
    %c0_11 = arith.constant 0 : index
    %c0_12 = arith.constant 0 : index
    %4 = vector.load %arg2[%c0_10, %c0_11, %c0_12] : memref<1x4x256xf32, #tpu.memory_space<vmem>>, vector<1x4x256xf32>
    %c0_13 = arith.constant 0 : index
    %c8 = arith.constant 8 : index
    %c0_14 = arith.constant 0 : index
    %5 = vector.load %arg4[%c0_13, %c8, %c0_14] : memref<1x16x256xf32, #tpu.memory_space<vmem>>, vector<1x4x256xf32>
    tpu.vector_store %arg4[%c0_13, %c8, %c0_14], %4 {strides = array<i32>} : memref<1x16x256xf32, #tpu.memory_space<vmem>>, vector<1x4x256xf32>,
    %c0_15 = arith.constant 0 : index
    %c0_16 = arith.constant 0 : index
    %c0_17 = arith.constant 0 : index
    %6 = vector.load %arg3[%c0_15, %c0_16, %c0_17] : memref<1x4x256xf32, #tpu.memory_space<vmem>>, vector<1x4x256xf32>
    %c0_18 = arith.constant 0 : index
    %c12 = arith.constant 12 : index
    %c0_19 = arith.constant 0 : index
    %7 = vector.load %arg4[%c0_18, %c12, %c0_19] : memref<1x16x256xf32, #tpu.memory_space<vmem>>, vector<1x4x256xf32>
    tpu.vector_store %arg4[%c0_18, %c12, %c0_19], %6 {strides = array<i32>} : memref<1x16x256xf32, #tpu.memory_space<vmem>>, vector<1x4x256xf32>,
    return
  }
  func.func @transform_0(%arg0: i32, %arg1: i32) -> (i32, i32, i32) {
    %c0_i32 = arith.constant 0 : i32
    %c0_i32_0 = arith.constant 0 : i32
    return %arg0, %c0_i32, %arg1 : i32, i32, i32
  }
  func.func @transform_1(%arg0: i32, %arg1: i32) -> (i32, i32, i32) {
    %c0_i32 = arith.constant 0 : i32
    %c0_i32_0 = arith.constant 0 : i32
    return %arg0, %c0_i32, %arg1 : i32, i32, i32
  }
  func.func @transform_2(%arg0: i32, %arg1: i32) -> (i32, i32, i32) {
    %c0_i32 = arith.constant 0 : i32
    %c0_i32_0 = arith.constant 0 : i32
    return %arg0, %c0_i32, %arg1 : i32, i32, i32
  }
}

</mosaic_0001>

<bundles_post_ra>
// kernel: tpu_custom_call.1
= control target key start
LH: loop header
LB: loop body
LE: loop exit
PB: predicated region body
PF: predicated region fallthrough
CT: control target
= control target key end

     0   :  { %7 = vsyncpa [#allocation3], 0  ;;  %s860_s0 = inlined_call_operand.hbm [shape: f32[2,4,256], index: 0, kind: input, shape index: {}]   ;;  %s861_s1 = inlined_call_operand.hbm [shape: f32[2,4,256], index: 1, kind: input, shape index: {}]   ;;  %s862_s2 = inlined_call_operand.hbm [shape: f32[2,16,256], index: 2, kind: output, shape index: {}]  }
   0x1   :  { %9 = vsyncpa [#allocation3 + $0x1], 0 }
   0x2   :  { %10 = vsyncpa [#allocation6], 0 }
   0x3   :  { %12 = vsyncpa [#allocation6 + $0x1], 0 }
   0x4   :  { %13 = vsyncpa [#allocation4], 0 }
   0x5   :  { %15 = vsyncpa [#allocation4 + $0x1], 0  ;;  %s637_s9 = smov 0   ;;  %s639_s10 = smov 0  }
   0x6   :  { %s641_s11 = smov 0   ;;  %s643_s12 = smov 0  }
   0x7   :  { %s645_s13 = smov 0   ;;  %s647_s14 = smov 0  }
   0x8 LB: > { %s376_s15 = sadd.s32 4294967295, %s615_s14   ;;  %s377_s16 = sadd.s32 4294967294, %s615_s14   ;;  %s615_s14 = sphi %s647_s14, %s21_s14   ;;  %s611_s13 = sphi %s645_s13, %s882_s13   ;;  %s607_s12 = sphi %s643_s12, %s881_s12   ;;  %s603_s11 = sphi %s641_s11, %s880_s11   ;;  %s599_s10 = sphi %s639_s10, %s879_s10   ;;  %s595_s9 = sphi %s637_s9, %s878_s9  }
   0x9   : > { %s33_s17 = sadd.s32 1, %s611_s13  ;;  %s42_s18 = sadd.s32 1, %s603_s11 }
   0xa   : > { %p35_p0 = scmp.ge.s32.totalorder %s33_s17, 2  ;;  %p49_p1 = scmp.ne.s32.totalorder %s603_s11, %s599_s10 }
   0xb   : > { %p50_p2 = scmp.eq.s32.totalorder %s615_s14, 0  ;;  %p55_p3 = scmp.ne.s32.totalorder %s599_s10, %s595_s9 }
   0xc   : > { %s884_s17 = smov (%p35_p0, %s33_s17), 0  ;;  %p56_p5 = scmp.eq.s32.totalorder %s376_s15, 0 }
   0xd   : > { %p678_p4 = por %p50_p2, %p49_p1  ;;  %s37_s20 = ssub.s32 %s611_s13, %s884_s17 }
   0xe   : > { %p109_p6 = scmp.eq.s32.totalorder %s376_s15, 1  ;;  %p40_p7 = scmp.eq.s32.totalorder %s37_s20, 0 }
   0xf   : > { %p684_p8 = por %p56_p5, %p55_p3  ;;  %p115_p10 = scmp.eq.s32.totalorder %s377_s16, 1 }
  0x10   : > { %p688_p9 = por %p109_p6, %p49_p1  ;;  %p415_p13 = scmp.lt.s32.totalorder %s615_s14, 2 }
  0x11   : > { %s866_s21 = scalar_select %p684_p8, 1, 0 }
  0x12   : > { %s867_s22 = scalar_select %p688_p9, 1, 0 }
  0x13   : > { %s693_s23 = scalar_select %p40_p7, %s603_s11, %s42_s18  }
  0x14   : > { %p695_p11 = por %p115_p10, %p55_p3  ;;  %s702_s25 = sand.u32 1, %s603_s11  }
  0x15   : > { %s380_s26 = sshll.u32 %s702_s25, 3  ;;  %s395_s27 = sshll.u32 %s611_s13, 7 }
  0x16   : > { %s868_s24 = scalar_select %p695_p11, 1, 0 }
  0x17   : > { %s711_s30 = scalar_lea.hbm %s860_s0, %s395_s27  ;;  %s139_s3 = scalar_lea.vmem [#allocation2], %s380_s26 }
  0x18   : > { %s149_s4 = sshll.u32 %s139_s3, 4  ;;  %p719_p0 = pnand %p415_p13, %p678_p4  ;;  %s715_s4 = int_to_ptr.vmem [resolvable:$true] %s149_s4 }
  0x19   : > { %s136_s6 = scalar_lea.sflag [#allocation3], %s702_s25  ;;  %s469_s7 = scalar_lea.hbm %s711_s30, 128 }
  0x1a   : > { %p470_p3 = scmp.ne.s32.totalorder %s711_s30, %s469_s7  ;;  %p471_p5 = pneg %p719_p0 }
  0x1b   : > { %s474_s16 = scalar_lea.hbm %s860_s0, 256  ;;  %p475_p4 = scmp.lt.u32.totalorder %s711_s30, %s860_s0 }
  0x1c   : > { %p472_p6 = pnand %p471_p5, %p470_p3  ;;  %p476_p10 = scmp.lt.u32.totalorder %s474_s16, %s469_s7 }
  0x1d   : > { %p478_p12 = scmp.lt.u32.totalorder %s469_s7, %s711_s30 }
  0x1e   : > { %p473_p7 = pneg %p472_p6  ;;  %p477_p13 = por %p476_p10, %p475_p4 }
  0x20   : > { %p479_p1 = por %p478_p12, %p477_p13 }
  0x22   : > { %p480_p2 = pnand %p479_p1, %p473_p7 }
  0x24   : > { %483 = shalt.err (!%p480_p2)
}
  0x25   : > { %s484_s20 = scalar_lea.vmem %s715_s4, 128  ;;  %s617_s28 = smov [#allocation2]  }
  0x26   : > { %p485_p3 = scmp.ne.s32.totalorder %s715_s4, %s484_s20  ;;  %s489_s29 = sshll.u32 %s617_s28, 4  ;;  %s490_s29 = int_to_ptr.vmem [resolvable:$false] %s489_s29 }
  0x27   : > { %s491_s3 = scalar_lea.vmem %s490_s29, 256  ;;  %p492_p9 = scmp.lt.s32.totalorder %s715_s4, %s490_s29 }
  0x28   : > { %p487_p6 = pnand %p485_p3, %p471_p5  ;;  %p493_p4 = scmp.lt.s32.totalorder %s491_s3, %s484_s20 }
  0x2a   : > { %p488_p11 = pneg %p487_p6  ;;  %p494_p10 = por %p493_p4, %p492_p9 }
  0x2c   : > { %p495_p12 = pnand %p494_p10, %p488_p11 }
  0x2e   : > { %498 = shalt.err (!%p495_p12)
}
  0x2f   : > { %407 = dma.hbm_to_vmem [thread:$0]  (!%p719_p0), %s711_s30, 128, %s715_s4, %s136_s6  }
  0x30   : > { %p870_p1 = scmp.lt.s32.totalorder %s615_s14, 3  ;;  %p871_p2 = scmp.ge.s32.totalorder %s615_s14, 1 }
  0x31   : > { %s764_s16 = scalar_lea.hbm %s861_s1, %s395_s27  ;;  %s160_s18 = scalar_lea.vmem [#allocation5], %s380_s26 }
  0x32   : > { %p755_p7 = pnand %p871_p2, %p870_p1  ;;  %s170_s19 = sshll.u32 %s160_s18, 4  ;;  %s171_s19 = int_to_ptr.vmem [resolvable:$true] %s170_s19 }
  0x33   : > { %s157_s30 = scalar_lea.sflag [#allocation6], %s702_s25  ;;  %s499_s4 = scalar_lea.hbm %s764_s16, 128 }
  0x34   : > { %s872_s7 = scalar_select %p755_p7, 1, 0 }
  0x35   : > { %p500_p9 = scmp.ne.s32.totalorder %s764_s16, %s499_s4  ;;  %s504_s27 = scalar_lea.hbm %s861_s1, 256 }
  0x36   : > { %p505_p3 = scmp.lt.u32.totalorder %s764_s16, %s861_s1  ;;  %p506_p6 = scmp.lt.u32.totalorder %s504_s27, %s499_s4 }
  0x37   : > { %p502_p11 = pnand %p500_p9, %p471_p5  ;;  %p508_p10 = scmp.lt.u32.totalorder %s499_s4, %s764_s16 }
  0x38   : > { %p507_p4 = por %p506_p6, %p505_p3 }
  0x39   : > { %p503_p13 = pneg %p502_p11 }
  0x3a   : > { %p509_p12 = por %p508_p10, %p507_p4 }
  0x3c   : > { %p510_p1 = pnand %p509_p12, %p503_p13 }
  0x3e   : > { %513 = shalt.err (!%p510_p1)
}
  0x3f   : > { %s514_s25 = scalar_lea.vmem %s171_s19, 128  ;;  %s618_s26 = smov [#allocation5]  }
  0x40   : > { %p515_p2 = scmp.ne.s32.totalorder %s171_s19, %s514_s25  ;;  %s519_s3 = sshll.u32 %s618_s26, 4  ;;  %s520_s3 = int_to_ptr.vmem [resolvable:$false] %s519_s3 }
  0x41   : > { %s521_s8 = scalar_lea.vmem %s520_s3, 256  ;;  %p522_p8 = scmp.lt.s32.totalorder %s171_s19, %s520_s3 }
  0x42   : > { %p517_p9 = pnand %p515_p2, %p471_p5  ;;  %p523_p7 = scmp.lt.s32.totalorder %s521_s8, %s514_s25 }
  0x44   : > { %p518_p11 = pneg %p517_p9  ;;  %p524_p3 = por %p523_p7, %p522_p8 }
  0x46   : > { %p525_p6 = pnand %p524_p3, %p518_p11 }
  0x48   : > { %528 = shalt.err (!%p525_p6)
}
  0x49   : > { %410 = dma.hbm_to_vmem [thread:$0]  (!%p719_p0), %s764_s16, 128, %s171_s19, %s157_s30  }
  0x4a   : > { %p873_p13 = scmp.ne.s32.totalorder %s872_s7, 0 }
  0x4b   : > { %s791_s15 = sand.u32 (!%p873_p13), 1, %s599_s10   ;;  %p874_p5 = scmp.ne.s32.totalorder (!%p873_p13), %s866_s21, 0 }
  0x4c   : > { %179 = sbr.rel (%p873_p13) target bundleno = 113 (0x71), region = 28  ;;  %s387_s18 = sshll.u32 (!%p873_p13), %s791_s15, 3 }
  0x4d   : > { %s182_s4 = scalar_lea.sflag (!%p873_p13), [#allocation3], %s791_s15  ;;  %s185_s6 = scalar_lea.vmem (!%p873_p13), [#allocation2], %s387_s18 }
  0x53   : > { %582 = dma.done.wait (%p874_p5), %s182_s4, 128  }
  0x54   : > { %584 = vsyncadd (%p874_p5), %s182_s4, 4294967168  ;;  %s191_s5 = scalar_lea.sflag [#allocation6], %s791_s15  ;;  %s194_s16 = scalar_lea.vmem [#allocation5], %s387_s18 }
  0x55   : > { %586 = dma.done.wait (%p874_p5), %s191_s5, 128  }
  0x56   : > { %588 = vsyncadd (%p874_p5), %s191_s5, 4294967168  ;;  %s389_s7 = sshll.u32 %s791_s15, 5  ;;  %s397_s20 = sshll.u32 %s607_s12, 9  ;;  %v223_v0 = vld [vmem:[%s185_s6] sm:$0xff]  ;;  %v229_v1 = vld [vmem:[%s194_s16] sm:$0xff] }
  0x57   : > { %s219_s19 = scalar_lea.vmem [#allocation7], %s389_s7  ;;  %s811_s29 = scalar_lea.hbm %s862_s2, %s397_s20  ;;  %v225_v2 = vcombine.high %v223_v0, %v223_v0  ;;  %v231_v3 = vcombine.low %v229_v1, %v229_v1 }
  0x58   : > { %s263_s30 = sshll.u32 %s219_s19, 4  ;;  %227 = vst [vmem:[%s219_s19] sm:$0xf] %v223_v0  ;;  %234 = vst [vmem:[%s219_s19 + $0x8] sm:$0xf0] %v229_v1  ;;  %s248_s12 = scalar_lea.sflag [#allocation4], %s791_s15  ;;  %s806_s30 = int_to_ptr.vmem [resolvable:$true] %s263_s30 }
  0x59   : > { %239 = vst [vmem:[%s219_s19 + $0x10] sm:$0xf] %v223_v0  ;;  %246 = vst [vmem:[%s219_s19 + $0x18] sm:$0xf0] %v229_v1  ;;  %s529_s21 = scalar_lea.vmem %s806_s30, 512  ;;  %p875_p0 = scmp.ne.s32.totalorder %s867_s22, 0 }
  0x5a   : > { %228 = vst [vmem:[%s219_s19 + $0x8] sm:$0xf] %v225_v2  ;;  %233 = vst [vmem:[%s219_s19] sm:$0xf0] %v231_v3  ;;  %p530_p8 = scmp.ne.s32.totalorder %s806_s30, %s529_s21  ;;  %s619_s25 = smov [#allocation7]  }
  0x5b   : > { %240 = vst [vmem:[%s219_s19 + $0x18] sm:$0xf] %v225_v2  ;;  %245 = vst [vmem:[%s219_s19 + $0x10] sm:$0xf0] %v231_v3  ;;  %s533_s26 = sshll.u32 %s619_s25, 4  ;;  %s534_s26 = int_to_ptr.vmem [resolvable:$false] %s533_s26 }
  0x5c   : > { %p531_p7 = pnand %p530_p8, %p875_p0  ;;  %s535_s3 = scalar_lea.vmem %s534_s26, 1024 }
  0x5d   : > { %p536_p10 = scmp.lt.s32.totalorder %s806_s30, %s534_s26  ;;  %p537_p12 = scmp.lt.s32.totalorder %s535_s3, %s529_s21 }
  0x5e   : > { %p532_p4 = pneg %p531_p7 }
  0x5f   : > { %p538_p1 = por %p537_p12, %p536_p10 }
  0x61   : > { %p539_p2 = pnand %p538_p1, %p532_p4 }
  0x63   : > { %542 = shalt.err (!%p539_p2)
}
  0x64   : > { %s543_s8 = scalar_lea.hbm %s811_s29, 512  ;;  %s547_s6 = scalar_lea.hbm %s862_s2, 1024 }
  0x65   : > { %p544_p9 = scmp.ne.s32.totalorder %s811_s29, %s543_s8  ;;  %p548_p6 = scmp.lt.u32.totalorder %s811_s29, %s862_s2 }
  0x66   : > { %p549_p13 = scmp.lt.u32.totalorder %s547_s6, %s543_s8  ;;  %p551_p8 = scmp.lt.u32.totalorder %s543_s8, %s811_s29 }
  0x67   : > { %p545_p11 = pnand %p544_p9, %p875_p0 }
  0x68   : > { %p550_p5 = por %p549_p13, %p548_p6 }
  0x69   : > { %p546_p3 = pneg %p545_p11 }
  0x6a   : > { %p552_p7 = por %p551_p8, %p550_p5 }
  0x6c   : > { %p553_p4 = pnand %p552_p7, %p546_p3 }
  0x6e   : > { %556 = shalt.err (!%p553_p4)
}
  0x6f   : > { %s620_s7 = smov 256   ;;  %s621_s19 = smov 16  }
  0x70   : > { %402 = dma.vmem_to_hbm [thread:$0]  (%p875_p0), %s806_s30, 512, %s811_s29, %s248_s12, %s620_s7, %s620_s7, %s621_s19  }
  0x71 PF: > { %s278_s20 = sand.u32 1, %s595_s9   ;;  %p876_p10 = scmp.ne.s32.totalorder %s868_s24, 0 }
  0x72   : > { %p877_p12 = scmp.ge.s32.totalorder %s615_s14, 2  ;;  %s279_s27 = scalar_lea.sflag [#allocation4], %s278_s20 }
  0x74   : > { %p412_p1 = pnand %p877_p12, %p876_p10 }
  0x76   : > { %590 = dma.done.wait (!%p412_p1), %s279_s27, 512  }
  0x77   : > { %592 = vsyncadd (!%p412_p1), %s279_s27, 4294966784  ;;  %s21_s14 = sadd.s32 1, %s615_s14   ;;  %s878_s9 = smov %s599_s10 }
  0x78   : > { %p18_p2 = scmp.ge.s32.totalorder %s21_s14, 4   ;;  %s879_s10 = smov %s603_s11 }
  0x79   : > { %s880_s11 = smov %s693_s23  ;;  %s881_s12 = smov %s611_s13 }
  0x7a   : > { %s882_s13 = smov %s884_s17  ;;  %20 = sbr.rel (!%p18_p2) target bundleno = 8 (0x8), region = 86 }
  0x81   :  { %284 = vsyncpa [#allocation3], 1 }
  0x82   :  { %286 = vsyncpa [#allocation3 + $0x1], 1 }
  0x83   :  { %287 = vsyncpa [#allocation6], 1 }
  0x84   :  { %289 = vsyncpa [#allocation6 + $0x1], 1 }
  0x85   :  { %290 = vsyncpa [#allocation4], 1 }
  0x86   :  { %292 = vsyncpa [#allocation4 + $0x1], 1 }

</bundles_post_ra>
